<compile_context>
chip_gen: v7x
topology: tpu7x:2x2x1
jax: 0.10.0
libtpu: 0.0.40
codegen_flags: <defaults>
</compile_context>

<pallas_src>
import jax
import jax.numpy as jnp
from jax.experimental import pallas as pl
from jax.experimental.pallas import tpu as pltpu


# Per-step input-DMA budget (per buffer set; Pallas double-buffers it).  4 MiB
# keeps us comfortably under the default scoped-VMEM limit on v5e/v6e/v7x.
_VMEM_INPUT_BUDGET = 4 << 20


def _choose_tiling(B, L, row_bytes, rows_per_tile):
    """Pick (TB, B_pad): batch elements per grid step and (rarely) padded batch.

    Constraints / preferences:
      - TB is a multiple of 8 (sublane-aligned output blocks) or TB == B
        (full-dim block), so every BlockSpec satisfies the (8, 128) rule.
      - TB divides B exactly whenever possible (no jnp.pad HBM round trip).
      - per-step rows (TB*L) near `rows_per_tile`, capped by the VMEM budget.
      - even grid preferred (v7x: one grid axis sharded over 2 TensorCores).
    """
    target_rows = max(8, min(rows_per_tile, _VMEM_INPUT_BUDGET // max(row_bytes, 1)))
    target_tb = max(1, target_rows // max(L, 1))

    if B * L <= target_rows or B <= target_tb:
        return B, B                                   # single step, full-dim blocks

    cands = [tb for tb in range(8 * (target_tb // 8), 7, -8) if B % tb == 0]
    for tb in cands:                                  # prefer an even grid (v7x)
        if (B // tb) % 2 == 0:
            return tb, B
    if cands:
        return cands[0], B
    if B * L <= 2 * target_rows:                      # still fits: one unpadded step
        return B, B
    # Rare fallback: B has no 8-aligned divisor and is too big for one step.
    tb = max(8, 8 * (target_tb // 8))
    return tb, pl.cdiv(B, tb) * tb


def _make_attention_kernel(n_s):
    def kernel(*refs):
        # refs = (s_0, ..., s_{n_s-1}, enc, w1, w2, w_out, h_out)
        s_refs = refs[:n_s]
        enc_ref, w1_ref, w2_ref, w_ref, h_ref = refs[n_s:]

        TB, L, H = enc_ref.shape
        A = w1_ref.shape[1]

        # Sum the N s tiles in VMEM (f32) — replaces the old HBM s_sum round trip.
        s_sum = s_refs[0][...].astype(jnp.float32)
        for r in s_refs[1:]:
            s_sum = s_sum + r[...].astype(jnp.float32)

        # fc over all TB*L flattened rows at once on the MXU, f32 accumulation.
        y = jnp.tanh(
            jnp.dot(s_sum, w1_ref[...], preferred_element_type=jnp.float32)
        )                                                   # (TM, A)
        y3 = y.reshape(TB, L, A)                            # sublane-aligned split

        # fc2: (A, 1) matvec as VPU broadcast-multiply + lane reduce.
        logits = jnp.sum(y3 * w2_ref[...], axis=-1)         # (TB, L)

        # Numerically-stable softmax over L; reciprocal on the EUP (approx).
        m = jnp.max(logits, axis=-1, keepdims=True)
        e = jnp.exp(logits - m)
        w = e * pl.reciprocal(jnp.sum(e, axis=-1, keepdims=True), approx=True)

        w_ref[...] = w                                      # (TB, L) 2-D slab

        # bmm(w.unsqueeze(1), enc): broadcast-multiply + sublane reduce over L.
        # enc may arrive as bf16 (DMA-format win); math stays f32 (v5e-safe).
        enc = enc_ref[...].astype(jnp.float32)
        h_ref[...] = jnp.sum(w[:, :, None] * enc, axis=1)   # (TB, H) 2-D slab

    return kernel


def attention_forward(s_list, enc_output, fc_weight, fc2_weight, *, rows_per_tile=2048):
    """
    s_list:      list of (B, L, node_features) arrays
    enc_output:  (B, L, hidden)  — any float dtype (bf16 halves its HBM DMA)
    fc_weight:   (attn_size, node_features)   torch nn.Linear layout, bias-free
    fc2_weight:  (1, attn_size)               torch nn.Linear layout, bias-free
    returns (w, h) with w: (B, L) f32, h: (B, 1, hidden) f32
    """
    s_list = [jnp.asarray(s) for s in s_list]
    enc_output = jnp.asarray(enc_output)            # keep native dtype for the DMA
    fc_weight = jnp.asarray(fc_weight, jnp.float32)
    fc2_weight = jnp.asarray(fc2_weight, jnp.float32)

    n_s = len(s_list)
    B, L, F = s_list[0].shape
    H = enc_output.shape[-1]
    A = fc_weight.shape[0]

    row_bytes = sum(F * s.dtype.itemsize for s in s_list) + H * enc_output.dtype.itemsize
    TB, B_pad = _choose_tiling(B, L, row_bytes, rows_per_tile)
    G = B_pad // TB

    if B_pad != B:  # rare fallback; padded rows give uniform-softmax garbage, sliced off
        pad = B_pad - B
        s_list = [jnp.pad(s, ((0, pad), (0, 0), (0, 0))) for s in s_list]
        enc_output = jnp.pad(enc_output, ((0, pad), (0, 0), (0, 0)))

    TM = TB * L

    # Flatten (B, L) into the MXU M dimension (metadata-only reshape under jit).
    s_flat = [s.reshape(B_pad * L, F) for s in s_list]
    w1 = fc_weight.T                  # (F, A)
    w2 = fc2_weight.reshape(1, A)     # (1, A)

    in_specs = (
        [pl.BlockSpec((TM, F), lambda t: (t, 0)) for _ in range(n_s)]
        + [
            pl.BlockSpec((TB, L, H), lambda t: (t, 0, 0)),
            pl.BlockSpec((F, A), lambda t: (0, 0)),   # weights stay VMEM-resident
            pl.BlockSpec((1, A), lambda t: (0, 0)),
        ]
    )

    w_out, h_out = pl.pallas_call(
        _make_attention_kernel(n_s),
        out_shape=(
            jax.ShapeDtypeStruct((B_pad, L), jnp.float32),
            jax.ShapeDtypeStruct((B_pad, H), jnp.float32),
        ),
        grid=(G,),
        in_specs=in_specs,
        out_specs=(
            pl.BlockSpec((TB, L), lambda t: (t, 0)),
            pl.BlockSpec((TB, H), lambda t: (t, 0)),
        ),
        compiler_params=pltpu.CompilerParams(
            dimension_semantics=("parallel",),
        ),
    )(*s_flat, enc_output, w1, w2)

    return w_out[:B], h_out[:B, None, :]             # (B, L), (B, 1, H)


def attention_reference(s_list, enc_output, fc_weight, fc2_weight):
    """Pure-JAX f32 reference mirroring the torch forward exactly."""
    s_stack = jnp.stack([jnp.asarray(s, jnp.float32) for s in s_list], axis=0)  # (N,B,L,F)
    y = jnp.tanh(jnp.sum(jnp.einsum("nblf,af->nbla", s_stack, fc_weight), axis=0))
    logits = jnp.einsum("bla,oa->blo", y, fc2_weight)[..., 0]                   # (B, L)
    w = jax.nn.softmax(logits, axis=1)
    h = jnp.einsum("bl,blh->bh", w, jnp.asarray(enc_output, jnp.float32))[:, None, :]
    return w, h


if __name__ == "__main__":
    # Small, module-consistent shapes.
    B, L = 2, 8
    node_features = 32       # F
    attn_size = 16           # A
    hidden = 32              # H
    N = 3                    # length of the `s` list

    key = jax.random.PRNGKey(0)
    k_s, k_enc, k_w1, k_w2 = jax.random.split(key, 4)

    s_keys = jax.random.split(k_s, N)
    s_list = [
        jax.random.normal(k, (B, L, node_features), dtype=jnp.float32)
        for k in s_keys
    ]
    enc_f32 = jax.random.normal(k_enc, (B, L, hidden), dtype=jnp.float32)
    # Feed enc_output as bf16: halves the dominant HBM input of this DMA-bound
    # kernel.  Elementwise math inside the kernel is upcast to f32 (v5e-safe).
    enc_bf16 = enc_f32.astype(jnp.bfloat16)

    # Deterministic parameter init (torch nn.Linear-style uniform bounds).
    bound1 = 1.0 / (node_features ** 0.5)
    bound2 = 1.0 / (attn_size ** 0.5)
    fc_weight = jax.random.uniform(
        k_w1, (attn_size, node_features), jnp.float32, -bound1, bound1
    )
    fc2_weight = jax.random.uniform(
        k_w2, (1, attn_size), jnp.float32, -bound2, bound2
    )

    w_out, h_out = attention_forward(s_list, enc_bf16, fc_weight, fc2_weight)
    w_out = jax.block_until_ready(w_out)
    h_out = jax.block_until_ready(h_out)

    # Correctness vs a pure-f32 reference on the same (bf16-rounded) enc values.
    # Tolerances cover the approximate EUP reciprocal in the softmax and the
    # bf16 enc transfer; structural bugs would produce O(0.1-1) errors.
    w_ref, h_ref = attention_reference(
        s_list, enc_bf16.astype(jnp.float32), fc_weight, fc2_weight
    )
    assert w_out.shape == (B, L) and h_out.shape == (B, 1, hidden)
    assert jnp.allclose(w_out, w_ref, rtol=2e-2, atol=2e-2)
    assert jnp.allclose(h_out, h_ref, rtol=2e-2, atol=2e-2)

    print("KERNEL_OK")
</pallas_src>

<mosaic_0001>
module attributes {stable_mosaic.version = 11 : i64} {
  func.func @kernel(%arg0: i32, %arg1: memref<16x32xf32, #tpu.memory_space<vmem>>, %arg2: memref<16x32xf32, #tpu.memory_space<vmem>>, %arg3: memref<16x32xf32, #tpu.memory_space<vmem>>, %arg4: memref<2x8x32xbf16, #tpu.memory_space<vmem>>, %arg5: memref<32x16xf32, #tpu.memory_space<vmem>>, %arg6: memref<1x16xf32, #tpu.memory_space<vmem>>, %arg7: memref<2x8xf32, #tpu.memory_space<vmem>>, %arg8: memref<2x32xf32, #tpu.memory_space<vmem>>) attributes {dimension_semantics = [#tpu.dimension_semantics<parallel>], iteration_bounds = array<i64: 1>, scalar_prefetch = 0 : i64, scratch_operands = 0 : i64, tpu.core_type = #tpu.core_type<tc>, window_params = [{transform_indices = @transform_0, window_bounds = array<i64: 16, 32>}, {transform_indices = @transform_1, window_bounds = array<i64: 16, 32>}, {transform_indices = @transform_2, window_bounds = array<i64: 16, 32>}, {transform_indices = @transform_3, window_bounds = array<i64: 2, 8, 32>}, {pipeline_mode = #tpu.pipeline_mode<synchronous>, transform_indices = @transform_4, window_bounds = array<i64: 32, 16>}, {pipeline_mode = #tpu.pipeline_mode<synchronous>, transform_indices = @transform_5, window_bounds = array<i64: 1, 16>}, {transform_indices = @transform_6, window_bounds = array<i64: 2, 8>}, {transform_indices = @transform_7, window_bounds = array<i64: 2, 32>}]} {
    %c0 = arith.constant 0 : index
    %c0_0 = arith.constant 0 : index
    %0 = vector.load %arg1[%c0, %c0_0] : memref<16x32xf32, #tpu.memory_space<vmem>>, vector<16x32xf32>
    %c0_1 = arith.constant 0 : index
    %c0_2 = arith.constant 0 : index
    %1 = vector.load %arg2[%c0_1, %c0_2] : memref<16x32xf32, #tpu.memory_space<vmem>>, vector<16x32xf32>
    %2 = arith.addf %0, %1 : vector<16x32xf32>
    %c0_3 = arith.constant 0 : index
    %c0_4 = arith.constant 0 : index
    %3 = vector.load %arg3[%c0_3, %c0_4] : memref<16x32xf32, #tpu.memory_space<vmem>>, vector<16x32xf32>
    %4 = arith.addf %2, %3 : vector<16x32xf32>
    %c0_5 = arith.constant 0 : index
    %c0_6 = arith.constant 0 : index
    %5 = vector.load %arg5[%c0_5, %c0_6] : memref<32x16xf32, #tpu.memory_space<vmem>>, vector<32x16xf32>
    %cst = arith.constant dense<0.000000e+00> : vector<16x16xf32>
    %6 = tpu.matmul %4, %5, %cst {dimension_numbers = #tpu.dot_dimension_numbers<[1], [0], [0], [1], [0, 0, 1, 1], [], []>} : vector<16x32xf32>, vector<32x16xf32>, vector<16x16xf32> -> vector<16x16xf32>
    %7 = math.tanh %6 : vector<16x16xf32>
    %8 = vector.shape_cast %7 : vector<16x16xf32> to vector<2x8x16xf32>
    %c0_7 = arith.constant 0 : index
    %c0_8 = arith.constant 0 : index
    %9 = vector.load %arg6[%c0_7, %c0_8] : memref<1x16xf32, #tpu.memory_space<vmem>>, vector<1x16xf32>
    %10 = vector.shape_cast %9 : vector<1x16xf32> to vector<1x1x16xf32>
    %11 = vector.broadcast %10 : vector<1x1x16xf32> to vector<2x8x16xf32>
    %12 = arith.mulf %8, %11 : vector<2x8x16xf32>
    %cst_9 = arith.constant dense<0.000000e+00> : vector<2x8xf32>
    %13 = vector.multi_reduction <add>, %12, %cst_9 [2] : vector<2x8x16xf32> to vector<2x8xf32>
    %cst_10 = arith.constant dense<0xFF800000> : vector<2xf32>
    %14 = vector.multi_reduction <maximumf>, %13, %cst_10 [1] : vector<2x8xf32> to vector<2xf32>
    %15 = vector.shape_cast %14 : vector<2xf32> to vector<2x1xf32>
    %16 = vector.broadcast %15 : vector<2x1xf32> to vector<2x8xf32>
    %17 = arith.subf %13, %16 : vector<2x8xf32>
    %18 = math.exp %17 : vector<2x8xf32>
    %cst_11 = arith.constant dense<0.000000e+00> : vector<2xf32>
    %19 = vector.multi_reduction <add>, %18, %cst_11 [1] : vector<2x8xf32> to vector<2xf32>
    %20 = vector.shape_cast %19 : vector<2xf32> to vector<2x1xf32>
    %21 = tpu.reciprocal %20 {approx = true} : vector<2x1xf32> -> vector<2x1xf32>
    %22 = vector.broadcast %21 : vector<2x1xf32> to vector<2x8xf32>
    %23 = arith.mulf %18, %22 : vector<2x8xf32>
    %c0_12 = arith.constant 0 : index
    %c0_13 = arith.constant 0 : index
    %24 = vector.load %arg7[%c0_12, %c0_13] : memref<2x8xf32, #tpu.memory_space<vmem>>, vector<2x8xf32>
    tpu.vector_store %arg7[%c0_12, %c0_13], %23 {strides = array<i32>} : memref<2x8xf32, #tpu.memory_space<vmem>>, vector<2x8xf32>,
    %c0_14 = arith.constant 0 : index
    %c0_15 = arith.constant 0 : index
    %c0_16 = arith.constant 0 : index
    %25 = vector.load %arg4[%c0_14, %c0_15, %c0_16] : memref<2x8x32xbf16, #tpu.memory_space<vmem>>, vector<2x8x32xbf16>
    %26 = arith.extf %25 : vector<2x8x32xbf16> to vector<2x8x32xf32>
    %27 = vector.shape_cast %23 : vector<2x8xf32> to vector<2x8x1xf32>
    %28 = vector.broadcast %27 : vector<2x8x1xf32> to vector<2x8x32xf32>
    %29 = arith.mulf %28, %26 : vector<2x8x32xf32>
    %cst_17 = arith.constant dense<0.000000e+00> : vector<2x32xf32>
    %30 = vector.multi_reduction <add>, %29, %cst_17 [1] : vector<2x8x32xf32> to vector<2x32xf32>
    %c0_18 = arith.constant 0 : index
    %c0_19 = arith.constant 0 : index
    %31 = vector.load %arg8[%c0_18, %c0_19] : memref<2x32xf32, #tpu.memory_space<vmem>>, vector<2x32xf32>
    tpu.vector_store %arg8[%c0_18, %c0_19], %30 {strides = array<i32>} : memref<2x32xf32, #tpu.memory_space<vmem>>, vector<2x32xf32>,
    return
  }
  func.func @transform_0(%arg0: i32) -> (i32, i32) {
    %c0_i32 = arith.constant 0 : i32
    %c0_i32_0 = arith.constant 0 : i32
    return %arg0, %c0_i32 : i32, i32
  }
  func.func @transform_1(%arg0: i32) -> (i32, i32) {
    %c0_i32 = arith.constant 0 : i32
    %c0_i32_0 = arith.constant 0 : i32
    return %arg0, %c0_i32 : i32, i32
  }
  func.func @transform_2(%arg0: i32) -> (i32, i32) {
    %c0_i32 = arith.constant 0 : i32
    %c0_i32_0 = arith.constant 0 : i32
    return %arg0, %c0_i32 : i32, i32
  }
  func.func @transform_3(%arg0: i32) -> (i32, i32, i32) {
    %c0_i32 = arith.constant 0 : i32
    %c0_i32_0 = arith.constant 0 : i32
    %c0_i32_1 = arith.constant 0 : i32
    return %arg0, %c0_i32, %c0_i32_0 : i32, i32, i32
  }
  func.func @transform_4(%arg0: i32) -> (i32, i32) {
    %c0_i32 = arith.constant 0 : i32
    %c0_i32_0 = arith.constant 0 : i32
    %c0_i32_1 = arith.constant 0 : i32
    return %c0_i32, %c0_i32_0 : i32, i32
  }
  func.func @transform_5(%arg0: i32) -> (i32, i32) {
    %c0_i32 = arith.constant 0 : i32
    %c0_i32_0 = arith.constant 0 : i32
    %c0_i32_1 = arith.constant 0 : i32
    return %c0_i32, %c0_i32_0 : i32, i32
  }
  func.func @transform_6(%arg0: i32) -> (i32, i32) {
    %c0_i32 = arith.constant 0 : i32
    %c0_i32_0 = arith.constant 0 : i32
    return %arg0, %c0_i32 : i32, i32
  }
  func.func @transform_7(%arg0: i32) -> (i32, i32) {
    %c0_i32 = arith.constant 0 : i32
    %c0_i32_0 = arith.constant 0 : i32
    return %arg0, %c0_i32 : i32, i32
  }
}

</mosaic_0001>

<bundles_post_ra>
// kernel: tpu_custom_call.1
= control target key start
LH: loop header
LB: loop body
LE: loop exit
PB: predicated region body
PF: predicated region fallthrough
CT: control target
= control target key end

     0   :  { %13 = vsyncpa [#allocation3], 0  ;;  %vm41_vm0 = vcmask 261120   ;;  %s496_s0 = inlined_call_operand.vmem [shape: f32[16,32], index: 0, kind: input, shape index: {}]   ;;  %s497_s1 = inlined_call_operand.vmem [shape: f32[16,32], index: 1, kind: input, shape index: {}]   ;;  %s498_s2 = inlined_call_operand.vmem [shape: f32[16,32], index: 2, kind: input, shape index: {}]   ;;  %s499_s3 = inlined_call_operand.vmem [shape: bf16[2,8,32], index: 3, kind: input, shape index: {}]   ;;  %s500_s4 = inlined_call_operand.vmem [shape: f32[32,16], index: 4, kind: input, shape index: {}]   ;;  %s501_s5 = inlined_call_operand.vmem [shape: f32[1,16], index: 5, kind: input, shape index: {}]   ;;  %s502_s6 = inlined_call_operand.hbm [shape: f32[2,8], index: 6, kind: output, shape index: {0}]   ;;  %s503_s7 = inlined_call_operand.hbm [shape: f32[2,32], index: 7, kind: output, shape index: {1}]  }
   0x1   :  { %v37_v0 = vld [vmem:[%s500_s4] sm:$0xff]  ;;  %v38_v1 = vld [vmem:[%s500_s4 + $0x8] sm:$0xff]  ;;  %v39_v2 = vld [vmem:[%s500_s4 + $0x10] sm:$0xff] }
   0x2   :  { %v311_v3 = vpack.c.bf16 %v38_v1, %v37_v0  ;;  %v40_v4 = vld [vmem:[%s500_s4 + $0x18] sm:$0xff]  ;;  %v27_v5 = vld [vmem:[%s496_s0] sm:$0xff]  ;;  %v28_v10 = vld [vmem:[%s496_s0 + $0x8] sm:$0xff] }
   0x3   :  { %v29_v6 = vld [vmem:[%s497_s1] sm:$0xff]  ;;  %v315_v7 = vpack.c.bf16 %v40_v4, %v39_v2  ;;  %v30_v11 = vld [vmem:[%s497_s1 + $0x8] sm:$0xff] }
   0x4   :  { %v31_v8 = vadd.f32 %v29_v6, %v27_v5  ;;  %v33_v9 = vld [vmem:[%s498_s2] sm:$0xff]  ;;  %312 = vmatprep.subr.bf16.mxu0 %v311_v3  ;;  %v32_v12 = vadd.f32 %v30_v11, %v28_v10 }
   0x5   :  { %14 = vsyncpa [#allocation5], 0  ;;  %314 = vmatpush3.bf16.msra.mxu0 %v311_v3  ;;  %v34_v14 = vld [vmem:[%s498_s2 + $0x8] sm:$0xff]  ;;  %v289_v18 = vld [vmem:[%s501_s5] ss:$0 sm:$0xff]  ;;  %vm134_vm1 = vcmask 130048   ;;  %v143_v25 = vlaneseq }
   0x6   :  { %v35_v13 = vadd.f32 %v33_v9, %v31_v8  ;;  %316 = vmatprep.subr.bf16.mxu0 %v315_v7  ;;  %v36_v15 = vadd.f32 %v34_v14, %v32_v12  ;;  %vm153_vm2 = vcmask 1041409   ;;  %vm156_vm3 = vcmask 58368   ;;  %v291_v59 = vld [vmem:[%s499_s3] sm:$0xff]   ;;  %s383_s20 = smov [#allocation2]  }
   0x7   :  { %v144_v26 = vand.u32 127, %v143_v25  ;;  %v146_v27 = vshrl.u32 %v143_v25, 7  ;;  %v382_v35 = vmov 0   ;;  %v292_v60 = vunpack.c.l.bf16 %v291_v59  ;;  %s265_s21 = sshll.u32 %s383_s20, 4  ;;  %s266_s21 = int_to_ptr.vmem [resolvable:$true] %s265_s21 }
   0x8   :  { %308 = vmatprep.mubr.msk.f32.mxu0 %vm41_vm0, %v35_v13  ;;  %323 = vset.pattern.permute.xlu0 %v382_v35  ;;  %v293_v63 = vunpack.c.h.bf16 %v291_v59  ;;  %s334_s3 = scalar_lea.vmem %s266_s21, 32  ;;  %p339_p1 = scmp.lt.s32.totalorder %s266_s21, %s266_s21 }
   0x9   :  { %318 = vmatpush3.bf16.msra.mxu0 %v315_v7  ;;  %v147_v29 = vsub.s32 %v144_v26, %v146_v27  ;;  %322 = vset.pattern.permute.xlu1 %v382_v35  ;;  %v163_v36 = vsub.s32 0, %v146_v27  ;;  %v167_v37 = vsub.s32 1, %v146_v27  ;;  %p335_p0 = scmp.ne.s32.totalorder %s266_s21, %s334_s3  ;;  %p340_p2 = scmp.lt.s32.totalorder %s334_s3, %s334_s3 }
   0xb   :  { %p341_p3 = por %p340_p2, %p339_p1 }
   0xc   :  { %309 = vmatmul.mubr.msk.f32.vlgmr.msra.gmra.mrb[0].mxu0 %vm41_vm0, %v36_v15 }
   0xd   :  { %p342_p4 = pnand %p341_p3, %p335_p0 }
  0xdf   :  { %v310_v16 = vpop.f32.mrb[0].mxu0 }
  0xe0   :  { %324 = vtanh.f32 %v310_v16  ;;  %v114_v17 = vpop.f32.mrb[1].mxu0 }
  0xe1   :  { %326 = vtanh.f32 %v114_v17 }
  0xea   :  { %v325_v19 = vpop.eup %324 }
  0xeb   :  { %v327_v20 = vpop.eup %326  ;;  %v133_v23 = vmul.f32 %v325_v19, %v289_v18 }
  0xec   :  { %v132_v21 = vmul.f32 %v327_v20, %v289_v18 }
  0xed   :  { %v138_v24 = vsel %vm134_vm1, %v133_v23, 0.0 }
  0xee   :  { %v135_v22 = vsel %vm134_vm1, %v132_v21, 0.0 }
  0xef   :  { %136 = vadd.xlane.f32.xlu0 %v135_v22 }
  0xf3   :  { %139 = vadd.xlane.f32.xlu0 %v138_v24 }
 0x17c   :  { %v137_v28 = vpop.xlane.xlu0 %136 }
 0x17d   :  { %v148_v31 = vrot.slane %v137_v28, %v147_v29 }
 0x180   :  { %v140_v30 = vpop.xlane.xlu0 %139 }
 0x181   :  { %v152_v32 = vrot.slane %v140_v30, %v147_v29 }
 0x183   :  { %v154_v33 = vsel %vm153_vm2, %v152_v32, %v148_v31 }
 0x184   :  { %v157_v34 = vsel %vm156_vm3, %v154_v33, -inf }
 0x185   :  { %158 = vmax.xlane.f32.xlu1 %v157_v34 }
 0x212   :  { %v159_v38 = vpop.xlane.xlu1 %158 }
 0x213   :  { %v164_v39 = vrot.slane %v159_v38, %v163_v36  ;;  %v168_v40 = vrot.slane %v159_v38, %v167_v37 }
 0x215   :  { %v171_v41 = vsub.f32 %v137_v28, %v164_v39  ;;  %v172_v42 = vsub.f32 %v140_v30, %v168_v40 }
 0x217   :  { %v173_v43 = vmul.f32 1.442695, %v171_v41  ;;  %v175_v44 = vmul.f32 1.442695, %v172_v42 }
 0x219   :  { %328 = vpow2.f32 %v173_v43 }
 0x21a   :  { %330 = vpow2.f32 %v175_v44 }
 0x223   :  { %v329_v45 = vpop.eup %328 }
 0x224   :  { %v331_v46 = vpop.eup %330  ;;  %180 = vperm.xlu1 %322, %v329_v45  }
 0x225   :  { %183 = vperm.xlu0 %323, %v331_v46  }
 0x2a3   :  { %v181_v47 = vpop.permute.xlu1 %180 }
 0x2a4   :  { %v184_v48 = vpop.permute.xlu0 %183  ;;  %v188_v49 = vrot.slane %v181_v47, %v147_v29 }
 0x2a5   :  { %v192_v50 = vrot.slane %v184_v48, %v147_v29 }
 0x2a7   :  { %v193_v51 = vsel %vm153_vm2, %v192_v50, %v188_v49 }
 0x2a8   :  { %v195_v52 = vsel %vm156_vm3, %v193_v51, 0.0 }
 0x2a9   :  { %196 = vadd.xlane.f32.xlu1 %v195_v52 }
 0x336   :  { %v197_v53 = vpop.xlane.xlu1 %196 }
 0x337   :  { %332 = vrcp.f32 %v197_v53 }
 0x341   :  { %v333_v54 = vpop.eup %332 }
 0x342   :  { %v203_v55 = vrot.slane %v333_v54, %v163_v36  ;;  %v207_v57 = vrot.slane %v333_v54, %v167_v37 }
 0x344   :  { %v210_v56 = vmul.f32 %v329_v45, %v203_v55  ;;  %v211_v58 = vmul.f32 %v331_v46, %v207_v57 }
 0x346   :  { %215 = vperm.xlu0 %323, %v210_v56  }
 0x34a   :  { %218 = vperm.xlu0 %323, %v211_v58  }
 0x3c5   :  { %v216_v61 = vpop.permute.xlu0 %215 }
 0x3c6   :  { %v237_v62 = vmul.f32 %v292_v60, %v216_v61  ;;  %v223_v3 = vrot.slane %v216_v61, %v147_v29 }
 0x3c8   :  { %v239_v0 = vsel %vm41_vm0, %v237_v62, 0.0 }
 0x3c9   :  { %v240_v1 = vrot.slane %v239_v0, 4  ;;  %v219_v2 = vpop.permute.xlu0 %218 }
 0x3ca   :  { %v227_v4 = vrot.slane %v219_v2, %v147_v29  ;;  %v238_v5 = vmul.f32 %v293_v63, %v219_v2 }
 0x3cb   :  { %v241_v6 = vadd.f32 %v240_v1, %v239_v0 }
 0x3cc   :  { %v246_v7 = vsel %vm41_vm0, %v238_v5, 0.0  ;;  %v228_v8 = vsel %vm153_vm2, %v227_v4, %v223_v3 }
 0x3cd   :  { %v242_v9 = vrot.slane %v241_v6, 2  ;;  %v247_v10 = vrot.slane %v246_v7, 4  ;;  %230 = vst.msk [vmem:[#allocation2] sm:$0x3] %vm156_vm3, %v228_v8 }
 0x3ce   :  { %345 = shalt.err (!%p342_p4)
}
 0x3cf   :  { %s346_s24 = scalar_lea.hbm %s502_s6, 32 }
 0x3d0   :  { %p347_p5 = scmp.ne.s32.totalorder %s502_s6, %s346_s24  ;;  %p350_p6 = scmp.lt.u32.totalorder %s346_s24, %s502_s6 }
 0x3d2   :  { %p352_p7 = pnand %p350_p6, %p347_p5 }
 0x3d4   :  { %355 = shalt.err (!%p352_p7)
}
 0x3d5   :  { %268 = dma.vmem_to_hbm [thread:$0]  %s266_s21, 32, %s502_s6, [#allocation3]   ;;  %v243_v11 = vadd.f32 %v242_v9, %v241_v6  ;;  %v248_v12 = vadd.f32 %v247_v10, %v246_v7  ;;  %vm257_vm4 = vcmask 254976  }
 0x3d6   :  { %s384_s8 = smov [#allocation4]  }
 0x3d7   :  { %v249_v13 = vrot.slane %v248_v12, 2  ;;  %v244_v14 = vrot.slane %v243_v11, 1  ;;  %s275_s9 = sshll.u32 %s384_s8, 4  ;;  %s276_s9 = int_to_ptr.vmem [resolvable:$true] %s275_s9 }
 0x3d8   :  { %s356_s10 = scalar_lea.vmem %s276_s9, 32  ;;  %p361_p9 = scmp.lt.s32.totalorder %s276_s9, %s276_s9 }
 0x3d9   :  { %v250_v15 = vadd.f32 %v249_v13, %v248_v12  ;;  %v245_v17 = vadd.f32 %v244_v14, %v243_v11  ;;  %p357_p8 = scmp.ne.s32.totalorder %s276_s9, %s356_s10  ;;  %p362_p10 = scmp.lt.s32.totalorder %s356_s10, %s356_s10 }
 0x3db   :  { %v251_v16 = vrot.slane %v250_v15, 1  ;;  %p363_p11 = por %p362_p10, %p361_p9 }
 0x3dd   :  { %v252_v18 = vadd.f32 %v251_v16, %v250_v15  ;;  %p364_p12 = pnand %p363_p11, %p357_p8 }
 0x3df   :  { %v255_v19 = vsel %vm153_vm2, %v252_v18, %v245_v17 }
 0x3e0   :  { %258 = vst.msk [vmem:[#allocation4] sm:$0x3] %vm257_vm4, %v255_v19 }
 0x3e1   :  { %367 = shalt.err (!%p364_p12)
}
 0x3e2   :  { %s368_s12 = scalar_lea.hbm %s503_s7, 32 }
 0x3e3   :  { %p369_p13 = scmp.ne.s32.totalorder %s503_s7, %s368_s12  ;;  %p372_p0 = scmp.lt.u32.totalorder %s368_s12, %s503_s7 }
 0x3e5   :  { %p374_p1 = pnand %p372_p0, %p369_p13 }
 0x3e7   :  { %377 = shalt.err (!%p374_p1)
}
 0x3e8   :  { %278 = dma.vmem_to_hbm [thread:$0]  %s276_s9, 32, %s503_s7, [#allocation5]  }
 0x3e9   :  { %378 = dma.done.wait [#allocation3], 32  }
 0x3ea   :  { %379 = vsyncadd [#allocation3], 4294967264 }
 0x3eb   :  { %380 = dma.done.wait [#allocation5], 32  }
 0x3ec   :  { %381 = vsyncadd [#allocation5], 4294967264 }
 0x3ed   :  { %285 = vsyncpa [#allocation3], 1 }
 0x3ee   :  { %286 = vsyncpa [#allocation5], 1 }

</bundles_post_ra>
